<compile_context>
chip_gen: v7x
topology: tpu7x:2x2x1
jax: 0.10.0
libtpu: 0.0.40
codegen_flags: <defaults>
</compile_context>

<pallas_src>
import jax
import jax.numpy as jnp
from jax.experimental import pallas as pl
from jax.experimental.pallas import tpu as pltpu


def _round_up(x, m):
    return ((x + m - 1) // m) * m


def _ffp_kernel(x_ref, w_ref, b_ref, o_ref):
    # x_ref: (C_in, TS)     spatial-lane-dense activation tile (NCHW-native)
    # w_ref: (C_out, C_in)  BN-scale-folded 1x1 conv weight (resident)
    # b_ref: (C_out, 1)     folded bias (conv bias + BN shift), lane-broadcast
    # o_ref: (C_out, TS)
    y = jnp.dot(w_ref[...], x_ref[...], preferred_element_type=jnp.float32)
    y = y + b_ref[...]
    # LeakyReLU(0.1): maximum(y, 0.1*y) == where(y>0, y, 0.1*y), one fewer VPU op.
    o_ref[...] = jnp.maximum(y, 0.1 * y).astype(o_ref.dtype)


def _physical_vmem_bytes():
    """Per-generation physical VMEM; conservative fallback if query fails."""
    try:
        info = pltpu.get_tpu_info()
        phys = getattr(info, "vmem_capacity_bytes", None)
        if phys:
            return int(phys)
    except Exception:
        pass
    return 64 * 1024 * 1024   # v7x per-TensorCore VMEM (smallest of the three gens)


def _plan_tiling(S, C_in, C_out, in_bytes, out_bytes):
    """Padding-aware spatial-tile sizing + scoped-VMEM limit.

    Returns (tile_s, vmem_limit_bytes).
    """
    phys = _physical_vmem_bytes()
    # Activation/output stream budget: ~1/4 of physical VMEM, capped.
    # v5e/v6e (128 MiB) -> 24 MiB; v7x (64 MiB) -> 16 MiB.
    budget = max(8 << 20, min(phys // 4, 24 << 20))

    # Sublane packing: 8 rows for 32-bit, 16 for bf16, 32 for int8.
    in_sub = max(8, 32 // max(in_bytes, 1))
    out_sub = max(8, 32 // max(out_bytes, 1))
    cin_p = _round_up(C_in, in_sub)
    cout_p = _round_up(C_out, out_sub)

    # Resident f32 weight/bias tiles (counted double-buffered, conservatively)
    # plus headroom for Mosaic internal scratch.
    resident = (2 * _round_up(C_out, 8) * _round_up(C_in, 128) * 4
                + 2 * _round_up(C_out, 8) * 128 * 4)
    headroom = 1 << 20

    # Double-buffered input + output streams: bytes per lane column (padded).
    per_col = 2 * (cin_p * in_bytes + cout_p * out_bytes)
    max_cols = max(128, (budget - resident - headroom) // per_col)

    TILE_CAP = 2048   # keeps several grid steps per batch -> megacore + pipelining
    tile = min(S, max_cols, TILE_CAP)
    # Prefer >= 4 spatial steps per batch when there is enough work; 512-lane
    # tiles already reach ~85% of HBM roofline, so this costs ~nothing.
    if S >= 4 * 512:
        tile = min(tile, _round_up(-(-S // 4), 128))
    if tile >= 128:
        tile = (tile // 128) * 128    # lane-dense tiles
    else:
        tile = S                      # tiny spatial extent: take the whole row

    footprint = per_col * tile + resident + headroom
    vmem_limit = int(min(max(footprint + (4 << 20), 16 << 20), max(phys // 2, 16 << 20)))
    return tile, vmem_limit


def fast_feature_processing(x_nchw, conv_w, conv_b, bn_gamma, bn_beta,
                            bn_mean, bn_var, eps=1e-5, out_dtype=None):
    """x_nchw: (N, C_in, H, W).  conv_w: (C_out, C_in, 1, 1)."""
    N, C_in, H, W = x_nchw.shape
    C_out = conv_w.shape[0]
    S = H * W
    out_dtype = x_nchw.dtype if out_dtype is None else out_dtype

    # Free reshape (no data movement): NCHW -> (N, C_in, H*W).
    x3 = x_nchw.reshape(N, C_in, S)

    # Fold BatchNorm (inference) into the 1x1-conv weight and a single bias.
    inv_std = 1.0 / jnp.sqrt(bn_var.astype(jnp.float32) + eps)
    scale = bn_gamma.astype(jnp.float32) * inv_std                      # (C_out,)
    w_scaled = conv_w.reshape(C_out, C_in).astype(jnp.float32) * scale[:, None]
    bias = ((conv_b.astype(jnp.float32) - bn_mean.astype(jnp.float32)) * scale
            + bn_beta.astype(jnp.float32)).reshape(C_out, 1)

    in_bytes = x3.dtype.itemsize
    out_bytes = jnp.dtype(out_dtype).itemsize
    tile_s, vmem_limit = _plan_tiling(S, C_in, C_out, in_bytes, out_bytes)
    grid = (N, pl.cdiv(S, tile_s))   # tail tile handled by Pallas masking

    # Memory-bound op: tell XLA's scheduler so fusion neighbours behave.
    cost = pl.CostEstimate(
        flops=2 * N * S * C_in * C_out,
        transcendentals=0,
        bytes_accessed=(N * S * (C_in * in_bytes + C_out * out_bytes)
                        + C_out * C_in * 4 + C_out * 4),
    )

    out3 = pl.pallas_call(
        _ffp_kernel,
        out_shape=jax.ShapeDtypeStruct((N, C_out, S), out_dtype),
        grid_spec=pltpu.PrefetchScalarGridSpec(
            num_scalar_prefetch=0,
            grid=grid,
            in_specs=[
                # activation tile: lanes = spatial pixels
                pl.BlockSpec((None, C_in, tile_s), lambda n, s: (n, 0, s)),
                # resident folded weight (constant block index -> loaded once)
                pl.BlockSpec((C_out, C_in), lambda n, s: (0, 0)),
                # resident folded bias column
                pl.BlockSpec((C_out, 1), lambda n, s: (0, 0)),
            ],
            out_specs=pl.BlockSpec((None, C_out, tile_s), lambda n, s: (n, 0, s)),
        ),
        compiler_params=pltpu.CompilerParams(
            dimension_semantics=("parallel", "parallel"),
            vmem_limit_bytes=vmem_limit),
        cost_estimate=cost,
    )(x3, w_scaled, bias)

    # Free reshape back: (N, C_out, H*W) -> NCHW.
    return out3.reshape(N, C_out, H, W)


if __name__ == "__main__":
    key = jax.random.PRNGKey(0)
    N, C_in, C_out, H, W = 2, 4, 8, 16, 16

    k_x, k_w, k_b, k_g, k_be, k_m, k_v = jax.random.split(key, 7)
    x = jax.random.normal(k_x, (N, C_in, H, W), dtype=jnp.float32)

    # Deterministic parameter init (synthetic, not a checkpoint load).
    conv_w = 0.1 * jax.random.normal(k_w, (C_out, C_in, 1, 1), dtype=jnp.float32)
    conv_b = 0.05 * jax.random.normal(k_b, (C_out,), dtype=jnp.float32)
    bn_gamma = 1.0 + 0.1 * jax.random.normal(k_g, (C_out,), dtype=jnp.float32)
    bn_beta = 0.1 * jax.random.normal(k_be, (C_out,), dtype=jnp.float32)
    bn_mean = 0.1 * jax.random.normal(k_m, (C_out,), dtype=jnp.float32)
    bn_var = jnp.abs(1.0 + 0.1 * jax.random.normal(k_v, (C_out,), dtype=jnp.float32))

    out = fast_feature_processing(x, conv_w, conv_b, bn_gamma, bn_beta,
                                  bn_mean, bn_var)
    jax.block_until_ready(out)

    # Pure-JAX NCHW reference check (no layout transforms).
    inv_std = 1.0 / jnp.sqrt(bn_var + 1e-5)
    y_ref = jnp.einsum('oi,nihw->nohw', conv_w.reshape(C_out, C_in), x)
    y_ref = y_ref + conv_b[None, :, None, None]
    y_ref = ((y_ref - bn_mean[None, :, None, None])
             * (bn_gamma * inv_std)[None, :, None, None]
             + bn_beta[None, :, None, None])
    y_ref = jnp.where(y_ref > 0, y_ref, 0.1 * y_ref)
    assert jnp.allclose(out, y_ref, atol=1e-4, rtol=1e-4), "mismatch vs reference"

    print("KERNEL_OK")
</pallas_src>

<mosaic_0001>
module attributes {stable_mosaic.version = 11 : i64} {
  func.func @_ffp_kernel(%arg0: i32, %arg1: i32, %arg2: memref<1x4x256xf32, #tpu.memory_space<vmem>>, %arg3: memref<8x4xf32, #tpu.memory_space<vmem>>, %arg4: memref<8x1xf32, #tpu.memory_space<vmem>>, %arg5: memref<1x8x256xf32, #tpu.memory_space<vmem>>) attributes {dimension_semantics = [#tpu.dimension_semantics<parallel>, #tpu.dimension_semantics<parallel>], iteration_bounds = array<i64: 2, 1>, scalar_prefetch = 0 : i64, scratch_operands = 0 : i64, tpu.core_type = #tpu.core_type<tc>, window_params = [{transform_indices = @transform_0, window_bounds = array<i64: 1, 4, 256>}, {pipeline_mode = #tpu.pipeline_mode<synchronous>, transform_indices = @transform_1, window_bounds = array<i64: 8, 4>}, {pipeline_mode = #tpu.pipeline_mode<synchronous>, transform_indices = @transform_2, window_bounds = array<i64: 8, 1>}, {transform_indices = @transform_3, window_bounds = array<i64: 1, 8, 256>}]} {
    %c0 = arith.constant 0 : index
    %c0_0 = arith.constant 0 : index
    %0 = vector.load %arg3[%c0, %c0_0] : memref<8x4xf32, #tpu.memory_space<vmem>>, vector<8x4xf32>
    %c0_1 = arith.constant 0 : index
    %c0_2 = arith.constant 0 : index
    %c0_3 = arith.constant 0 : index
    %1 = vector.load %arg2[%c0_1, %c0_2, %c0_3] : memref<1x4x256xf32, #tpu.memory_space<vmem>>, vector<1x4x256xf32>
    %2 = vector.shape_cast %1 : vector<1x4x256xf32> to vector<4x256xf32>
    %cst = arith.constant dense<0.000000e+00> : vector<8x256xf32>
    %3 = tpu.matmul %0, %2, %cst {dimension_numbers = #tpu.dot_dimension_numbers<[1], [0], [0], [1], [0, 0, 1, 1], [], []>} : vector<8x4xf32>, vector<4x256xf32>, vector<8x256xf32> -> vector<8x256xf32>
    %c0_4 = arith.constant 0 : index
    %c0_5 = arith.constant 0 : index
    %4 = vector.load %arg4[%c0_4, %c0_5] : memref<8x1xf32, #tpu.memory_space<vmem>>, vector<8x1xf32>
    %5 = vector.broadcast %4 : vector<8x1xf32> to vector<8x256xf32>
    %6 = arith.addf %3, %5 : vector<8x256xf32>
    %cst_6 = arith.constant 1.000000e-01 : f32
    %7 = vector.broadcast %cst_6 : f32 to vector<8x256xf32>
    %8 = arith.mulf %7, %6 : vector<8x256xf32>
    %9 = arith.maximumf %6, %8 : vector<8x256xf32>
    %c0_7 = arith.constant 0 : index
    %c0_8 = arith.constant 0 : index
    %c0_9 = arith.constant 0 : index
    %10 = vector.load %arg5[%c0_7, %c0_8, %c0_9] : memref<1x8x256xf32, #tpu.memory_space<vmem>>, vector<1x8x256xf32>
    %11 = vector.shape_cast %10 : vector<1x8x256xf32> to vector<8x256xf32>
    %12 = vector.shape_cast %9 : vector<8x256xf32> to vector<1x8x256xf32>
    tpu.vector_store %arg5[%c0_7, %c0_8, %c0_9], %12 {strides = array<i32>} : memref<1x8x256xf32, #tpu.memory_space<vmem>>, vector<1x8x256xf32>,
    return
  }
  func.func @transform_0(%arg0: i32, %arg1: i32) -> (i32, i32, i32) {
    %c0_i32 = arith.constant 0 : i32
    %c0_i32_0 = arith.constant 0 : i32
    return %arg0, %c0_i32, %arg1 : i32, i32, i32
  }
  func.func @transform_1(%arg0: i32, %arg1: i32) -> (i32, i32) {
    %c0_i32 = arith.constant 0 : i32
    %c0_i32_0 = arith.constant 0 : i32
    %c0_i32_1 = arith.constant 0 : i32
    return %c0_i32, %c0_i32_0 : i32, i32
  }
  func.func @transform_2(%arg0: i32, %arg1: i32) -> (i32, i32) {
    %c0_i32 = arith.constant 0 : i32
    %c0_i32_0 = arith.constant 0 : i32
    %c0_i32_1 = arith.constant 0 : i32
    return %c0_i32, %c0_i32_0 : i32, i32
  }
  func.func @transform_3(%arg0: i32, %arg1: i32) -> (i32, i32, i32) {
    %c0_i32 = arith.constant 0 : i32
    %c0_i32_0 = arith.constant 0 : i32
    return %arg0, %c0_i32, %arg1 : i32, i32, i32
  }
}

</mosaic_0001>

<bundles_post_ra>
// kernel: tpu_custom_call.1
= control target key start
LH: loop header
LB: loop body
LE: loop exit
PB: predicated region body
PF: predicated region fallthrough
CT: control target
= control target key end

     0   :  { %8 = vsyncpa [#allocation3], 0  ;;  %s687_s0 = inlined_call_operand.vmem [shape: f32[2,4,256], index: 0, kind: input, shape index: {}]   ;;  %s688_s1 = inlined_call_operand.vmem [shape: f32[8,4], index: 1, kind: input, shape index: {}]   ;;  %s689_s2 = inlined_call_operand.vmem [shape: f32[8,1], index: 2, kind: input, shape index: {}]   ;;  %s690_s3 = inlined_call_operand.hbm [shape: f32[2,8,256], index: 3, kind: output, shape index: {}]  }
   0x1   :  { %10 = vsyncpa [#allocation3 + $0x1], 0  ;;  %s569_s12 = smov 0   ;;  %s571_s13 = smov 0  }
   0x2   :  { %s573_s14 = smov 0   ;;  %s575_s15 = smov 0  }
   0x3   :  { %s577_s16 = smov 0   ;;  %s579_s17 = smov 0  }
   0x4 LB: > { %s389_s18 = sadd.s32 4294967295, %s544_s17   ;;  %s390_s19 = sadd.s32 4294967294, %s544_s17   ;;  %s544_s17 = sphi %s579_s17, %s16_s17   ;;  %s540_s16 = sphi %s577_s16, %s697_s16   ;;  %s536_s15 = sphi %s575_s15, %s696_s15   ;;  %s532_s14 = sphi %s573_s14, %s695_s14   ;;  %s528_s13 = sphi %s571_s13, %s694_s13   ;;  %s524_s12 = sphi %s569_s12, %s693_s12  }
   0x5   : > { %s28_s20 = sadd.s32 1, %s540_s16  ;;  %s107_s21 = sadd.s32 1, %s532_s14 }
   0x6   : > { %p30_p0 = scmp.ge.s32.totalorder %s28_s20, 2  ;;  %p117_p1 = scmp.ne.s32.totalorder %s532_s14, %s528_s13 }
   0x7   : > { %p118_p2 = scmp.eq.s32.totalorder %s389_s18, 1  ;;  %p123_p3 = scmp.ne.s32.totalorder %s528_s13, %s524_s12 }
   0x8   : > { %s699_s20 = smov (%p30_p0, %s28_s20), 0  ;;  %p124_p5 = scmp.eq.s32.totalorder %s390_s19, 1 }
   0x9   : > { %p609_p4 = por %p118_p2, %p117_p1  ;;  %s102_s23 = ssub.s32 %s540_s16, %s699_s20 }
   0xa   : > { %p393_p6 = scmp.ge.s32.totalorder %s544_s17, 1  ;;  %p105_p7 = scmp.eq.s32.totalorder %s102_s23, 0 }
   0xb   : > { %p616_p8 = por %p124_p5, %p123_p3  ;;  %p161_p9 = scmp.lt.s32.totalorder %s544_s17, 3 }
   0xc   : > { %s622_s25 = scalar_select %p105_p7, %s532_s14, %s107_s21  }
   0xd   : > { %p162_p10 = pnand %p393_p6, %p161_p9 }
   0xe   : > { %p190_p11 = scmp.lt.s32.totalorder (!%p162_p10), %s536_s15, 1  ;;  %v546_v0 = vmov (!%p162_p10), 0.0   ;;  %v547_v1 = vmov (!%p162_p10), 0   ;;  %v202_v2 = vld [vmem:[%s689_s2] sm:$0xff] (!%p162_p10)  ;;  %vm214_vm0 = vcmask (!%p162_p10), 1043456   ;;  %vm210_vm1 = vcmask (!%p162_p10), 31744  }
   0xf   : > { %165 = sbr.rel (%p162_p10) target bundleno = 264 (0x108), region = 32  ;;  %283 = vmatprep.mubr.f32.mxu0 (!%p162_p10), %v546_v0  ;;  %464 = vset.pattern.permute.xlu0 (!%p162_p10), %v547_v1  ;;  %v200_v5 = vld [vmem:[%s688_s1] sm:$0xff] (!%p162_p10)  ;;  %s186_s8 = sand.u32 (!%p162_p10), 1, %s528_s13  }
  0x10   : > { %205 = vperm.xlu0 (!%p162_p10), %464, %v202_v2   ;;  %s394_s9 = sshll.u32 (!%p162_p10), %s186_s8, 4  ;;  %s406_s10 = sshll.u32 (!%p162_p10), %s536_s15, 8 }
  0x11   : > { %s188_s11 = scalar_lea.vmem (!%p162_p10), [#allocation2], %s394_s9  ;;  %s640_s23 = scalar_lea.hbm (!%p162_p10), %s690_s3, %s406_s10 }
  0x12   : > { %s313_s18 = sshll.u32 (!%p162_p10), %s188_s11, 4  ;;  %s297_s26 = scalar_lea.sflag (!%p162_p10), [#allocation3], %s186_s8  ;;  %s642_s18 = int_to_ptr.vmem [resolvable:$true] %s313_s18 }
  0x13   : > { %s466_s27 = scalar_lea.vmem (!%p162_p10), %s642_s18, 256 }
  0x14   : > { %p467_p12 = scmp.ne.s32.totalorder (!%p162_p10), %s642_s18, %s466_s27 }
  0x16   : > { %s191_s28 = scalar_select %p190_p11, %s536_s15, 1 }
  0x17   : > { %p468_p13 = pnand %p467_p12, %p609_p4  ;;  %s548_s15 = smov [#allocation2]  }
  0x18   : > { %s405_s29 = sshll.u32 %s191_s28, 3  ;;  %s470_s28 = sshll.u32 %s548_s15, 4  ;;  %s471_s28 = int_to_ptr.vmem [resolvable:$false] %s470_s28 }
  0x19   : > { %s197_s5 = scalar_lea.vmem %s687_s0, %s405_s29  ;;  %p469_p0 = pneg %p468_p13 }
  0x1a   : > { %v201_v3 = vld [vmem:[%s197_s5] sm:$0xff]  ;;  %s472_s29 = scalar_lea.vmem %s471_s28, 512  ;;  %p473_p1 = scmp.lt.s32.totalorder %s642_s18, %s471_s28 }
  0x1b   : > { %v209_v4 = vcombine.high %v201_v3, %v201_v3  ;;  %p474_p2 = scmp.lt.s32.totalorder %s472_s29, %s466_s27 }
  0x1d   : > { %397 = vmatprep.subr.msk.mxu0 %vm214_vm0, %v209_v4  ;;  %p475_p3 = por %p474_p2, %p473_p1 }
  0x1e   : > { %398 = vmatpush1.msk.msra.mxu0 %vm214_vm0, %v201_v3 }
  0x1f   : > { %399 = vmatmul.mubr.msk.f32.vlgmr.msra.gmra.mrb[0].mxu0 %vm210_vm1, %v200_v5  ;;  %p476_p5 = pnand %p475_p3, %p469_p0 }
  0x8f   : > { %v206_v6 = vpop.permute.xlu0 %205 }
  0xf2   : > { %v285_v7 = vpop.f32.mrb[0].mxu0 }
  0xf3   : > { %v286_v8 = vadd.f32 %v285_v7, %v206_v6  ;;  %v287_v9 = vpop.f32.mrb[1].mxu0 }
  0xf4   : > { %v288_v10 = vadd.f32 %v287_v9, %v206_v6 }
  0xf5   : > { %v290_v11 = vmul.f32 0.1, %v286_v8 }
  0xf6   : > { %v291_v12 = vmul.f32 0.1, %v288_v10 }
  0xf7   : > { %v292_v13 = vmax.f32 %v286_v8, %v290_v11 }
  0xf8   : > { %v293_v14 = vmax.f32 %v288_v10, %v291_v12 }
  0xf9   : > { %294 = vst [vmem:[%s188_s11] sm:$0xff] %v292_v13 }
  0xfa   : > { %295 = vst [vmem:[%s188_s11 + $0x8] sm:$0xff] %v293_v14 }
  0xfb   : > { %479 = shalt.err (!%p476_p5)
}
  0xfc   : > { %s480_s30 = scalar_lea.hbm %s640_s23, 256  ;;  %s484_s6 = scalar_lea.hbm %s690_s3, 512 }
  0xfd   : > { %p481_p6 = scmp.ne.s32.totalorder %s640_s23, %s480_s30  ;;  %p485_p10 = scmp.lt.u32.totalorder %s640_s23, %s690_s3 }
  0xfe   : > { %p486_p11 = scmp.lt.u32.totalorder %s484_s6, %s480_s30  ;;  %p488_p13 = scmp.lt.u32.totalorder %s480_s30, %s640_s23 }
  0xff   : > { %p482_p7 = pnand %p481_p6, %p609_p4 }
 0x100   : > { %p487_p12 = por %p486_p11, %p485_p10 }
 0x101   : > { %p483_p9 = pneg %p482_p7 }
 0x102   : > { %p489_p0 = por %p488_p13, %p487_p12 }
 0x104   : > { %p490_p1 = pnand %p489_p0, %p483_p9 }
 0x106   : > { %493 = shalt.err (!%p490_p1)
}
 0x107   : > { %407 = dma.vmem_to_hbm [thread:$0]  (%p609_p4), %s642_s18, 256, %s640_s23, %s297_s26  }
 0x108 PF: > { %p413_p2 = scmp.ge.s32.totalorder %s544_s17, 2  ;;  %s325_s9 = sand.u32 1, %s524_s12  }
 0x109   : > { %s326_s10 = scalar_lea.sflag [#allocation3], %s325_s9 }
 0x10a   : > { %p410_p3 = pnand %p413_p2, %p616_p8 }
 0x10c   : > { %519 = dma.done.wait (!%p410_p3), %s326_s10, 256  }
 0x10d   : > { %521 = vsyncadd (!%p410_p3), %s326_s10, 4294967040  ;;  %s16_s17 = sadd.s32 1, %s544_s17   ;;  %s693_s12 = smov %s528_s13 }
 0x10e   : > { %p13_p5 = scmp.ge.s32.totalorder %s16_s17, 4   ;;  %s694_s13 = smov %s532_s14 }
 0x10f   : > { %s695_s14 = smov %s622_s25  ;;  %s696_s15 = smov %s540_s16 }
 0x110   : > { %s697_s16 = smov %s699_s20  ;;  %15 = sbr.rel (!%p13_p5) target bundleno = 4 (0x4), region = 67 }
 0x117   :  { %331 = vsyncpa [#allocation3], 1 }
 0x118   :  { %333 = vsyncpa [#allocation3 + $0x1], 1 }

</bundles_post_ra>
